<compile_context>
chip_gen: v6e
topology: v6e:2x2x1
jax: 0.10.0
libtpu: 0.0.40
codegen_flags: <defaults>
</compile_context>

<pallas_src>
import jax
import jax.numpy as jnp
from jax.experimental import pallas as pl
from jax.experimental.pallas import tpu as pltpu


def _cdiv(a, b):
    return (a + b - 1) // b


def _round_up(n, m):
    return _cdiv(n, m) * m


def _pick_tile_b(B, D, itemsize, *, per_buffer_bytes=6 * 1024 * 1024,
                 max_rows=32768):
    """Pick a batch tile: as many rows as fit one ~6 MiB VMEM buffer.

    BlockSpec pipelining double-buffers the input, so VMEM cost is ~2x this
    (safe under the 32 MiB scoped limit on every generation, incl. v7x's
    64 MiB physical VMEM per TC).
    """
    rows = per_buffer_bytes // max(D * itemsize, 1)
    rows = max(8, min(int(rows), max_rows))
    rows = (rows // 8) * 8                      # sublane multiple

    b8 = _round_up(B, 8)
    if rows >= b8:
        return b8                               # one tile covers the batch
    # Balance tiles so padded waste is < 8 rows per tile.
    n_tiles = _cdiv(b8, rows)
    tile = _round_up(_cdiv(b8, n_tiles), 8)
    return max(8, tile)


def _linear_kernel(x_ref, w_ref, b_ref, o_ref):
    # VPU elementwise multiply + f32 row-sum; no MXU fill/drain on the critical
    # path and f32 accumulation regardless of input dtype.
    x = x_ref[...].astype(jnp.float32)                   # (tile_b, D)
    w = w_ref[...].astype(jnp.float32)                   # (1, D) broadcast over rows
    acc = jnp.sum(x * w, axis=-1, keepdims=True)         # (tile_b, 1), f32
    o_ref[...] = (acc + b_ref[0]).astype(o_ref.dtype)    # scalar bias from SMEM


def weak_classifier_forward(x, weight, bias, *, tile_b=None,
                            vmem_limit_bytes=32 * 1024 * 1024):
    """Forward of WeakClassifier: y = x @ weight.T + bias.

    x:      (B, D) float32 (bf16 also accepted; accumulation stays f32)
    weight: (1, D)  -- torch nn.Linear weight layout (out_features=1, in=D)
    bias:   (1,)
    returns (B, 1) in x.dtype
    """
    B, D = x.shape
    out_dtype = x.dtype
    itemsize = jnp.dtype(x.dtype).itemsize

    if tile_b is None:
        tile_b = _pick_tile_b(B, D, itemsize)
    tile_b = max(8, (int(tile_b) // 8) * 8)
    tile_b = min(tile_b, _round_up(B, 8))

    # Pad batch so every block satisfies the (8, 128) divisibility rule and the
    # grid divides evenly; padding is sliced off below.
    B_pad = _round_up(B, tile_b)
    if B_pad != B:
        x = jnp.pad(x, ((0, B_pad - B), (0, 0)))

    grid = (B_pad // tile_b,)

    cost = pl.CostEstimate(
        flops=2 * B_pad * D,
        transcendentals=0,
        bytes_accessed=(itemsize * B_pad * D                      # x
                        + jnp.dtype(weight.dtype).itemsize * D    # weight
                        + jnp.dtype(bias.dtype).itemsize          # bias
                        + jnp.dtype(out_dtype).itemsize * B_pad), # out
    )

    out = pl.pallas_call(
        _linear_kernel,
        out_shape=jax.ShapeDtypeStruct((B_pad, 1), out_dtype),
        grid_spec=pl.GridSpec(
            grid=grid,
            in_specs=[
                # x: batch-tiled, auto double-buffered by the BlockSpec pipeline.
                pl.BlockSpec((tile_b, D), lambda i: (i, 0)),
                # weight row: same block every step -> stays resident in VMEM.
                pl.BlockSpec((1, D), lambda i: (0, 0)),
                # bias: single scalar in SMEM (no VMEM vreg / broadcast cost).
                pl.BlockSpec(memory_space=pltpu.MemorySpace.SMEM),
            ],
            out_specs=pl.BlockSpec((tile_b, 1), lambda i: (i, 0)),
        ),
        compiler_params=pltpu.CompilerParams(
            # Batch tiles are fully independent -> parallel (2x on v7x dual TC).
            dimension_semantics=("parallel",),
            vmem_limit_bytes=vmem_limit_bytes,
        ),
        cost_estimate=cost,
    )(x, weight, bias)

    if B_pad != B:
        out = out[:B]
    return out


if __name__ == "__main__":
    key = jax.random.PRNGKey(0)
    k_x, k_w, k_b = jax.random.split(key, 3)

    # Small shapes consistent with Linear(input_dim, 1); batch deliberately not
    # a multiple of 8 so the padding path is exercised.
    batch, input_dim = 20, 32

    x = jax.random.normal(k_x, (batch, input_dim), dtype=jnp.float32)

    # nn.Linear default init: U(-1/sqrt(D), 1/sqrt(D)).
    bound = 1.0 / (float(input_dim) ** 0.5)
    w = jax.random.uniform(k_w, (1, input_dim), dtype=jnp.float32,
                           minval=-bound, maxval=bound)   # torch weight (1, D)
    b = jax.random.uniform(k_b, (1,), dtype=jnp.float32,
                           minval=-bound, maxval=bound)   # torch bias (1,)

    ref = x @ w.T + b

    # 1) Forced small tile: multi-step pipelined grid + batch padding path.
    out_small = weak_classifier_forward(x, w, b, tile_b=8)
    jax.block_until_ready(out_small)
    assert out_small.shape == (batch, 1)
    assert jnp.allclose(out_small, ref, atol=1e-5, rtol=1e-5)

    # 2) Auto tile selection (single tile covering the whole batch here).
    out_auto = weak_classifier_forward(x, w, b)
    jax.block_until_ready(out_auto)
    assert out_auto.shape == (batch, 1)
    assert jnp.allclose(out_auto, ref, atol=1e-5, rtol=1e-5)

    print("KERNEL_OK")
</pallas_src>

<mosaic_0001>
module attributes {stable_mosaic.version = 11 : i64} {
  func.func @_linear_kernel(%arg0: i32, %arg1: memref<8x32xf32, #tpu.memory_space<vmem>>, %arg2: memref<1x32xf32, #tpu.memory_space<vmem>>, %arg3: memref<1xf32, #tpu.memory_space<smem>>, %arg4: memref<8x1xf32, #tpu.memory_space<vmem>>) attributes {dimension_semantics = [#tpu.dimension_semantics<parallel>], iteration_bounds = array<i64: 3>, scalar_prefetch = 0 : i64, scratch_operands = 0 : i64, tpu.core_type = #tpu.core_type<tc>, window_params = [{transform_indices = @transform_0, window_bounds = array<i64: 8, 32>}, {pipeline_mode = #tpu.pipeline_mode<synchronous>, transform_indices = @transform_1, window_bounds = array<i64: 1, 32>}, {transform_indices = @transform_2, window_bounds = array<i64: 1>}, {transform_indices = @transform_3, window_bounds = array<i64: 8, 1>}]} {
    %c0 = arith.constant 0 : index
    %c0_0 = arith.constant 0 : index
    %0 = vector.load %arg1[%c0, %c0_0] : memref<8x32xf32, #tpu.memory_space<vmem>>, vector<8x32xf32>
    %c0_1 = arith.constant 0 : index
    %c0_2 = arith.constant 0 : index
    %1 = vector.load %arg2[%c0_1, %c0_2] : memref<1x32xf32, #tpu.memory_space<vmem>>, vector<1x32xf32>
    %2 = vector.broadcast %1 : vector<1x32xf32> to vector<8x32xf32>
    %3 = arith.mulf %0, %2 : vector<8x32xf32>
    %cst = arith.constant dense<0.000000e+00> : vector<8xf32>
    %4 = vector.multi_reduction <add>, %3, %cst [1] : vector<8x32xf32> to vector<8xf32>
    %5 = vector.shape_cast %4 : vector<8xf32> to vector<8x1xf32>
    %c0_3 = arith.constant 0 : index
    %6 = memref.load %arg3[%c0_3] : memref<1xf32, #tpu.memory_space<smem>>
    %7 = vector.broadcast %6 : f32 to vector<8x1xf32>
    %8 = arith.addf %5, %7 : vector<8x1xf32>
    %c0_4 = arith.constant 0 : index
    %c0_5 = arith.constant 0 : index
    %9 = vector.load %arg4[%c0_4, %c0_5] : memref<8x1xf32, #tpu.memory_space<vmem>>, vector<8x1xf32>
    tpu.vector_store %arg4[%c0_4, %c0_5], %8 {strides = array<i32>} : memref<8x1xf32, #tpu.memory_space<vmem>>, vector<8x1xf32>,
    return
  }
  func.func @transform_0(%arg0: i32) -> (i32, i32) {
    %c0_i32 = arith.constant 0 : i32
    %c0_i32_0 = arith.constant 0 : i32
    return %arg0, %c0_i32 : i32, i32
  }
  func.func @transform_1(%arg0: i32) -> (i32, i32) {
    %c0_i32 = arith.constant 0 : i32
    %c0_i32_0 = arith.constant 0 : i32
    %c0_i32_1 = arith.constant 0 : i32
    return %c0_i32, %c0_i32_0 : i32, i32
  }
  func.func @transform_2(%arg0: i32) -> i32 {
    %c0_i32 = arith.constant 0 : i32
    %c0_i32_0 = arith.constant 0 : i32
    return %c0_i32 : i32
  }
  func.func @transform_3(%arg0: i32) -> (i32, i32) {
    %c0_i32 = arith.constant 0 : i32
    %c0_i32_0 = arith.constant 0 : i32
    return %arg0, %c0_i32 : i32, i32
  }
}

</mosaic_0001>

<bundles_post_ra>
// kernel: tpu_custom_call.1
= control target key start
LH: loop header
LB: loop body
LE: loop exit
PB: predicated region body
PF: predicated region fallthrough
CT: control target
= control target key end

     0   :  { %s511_s0 = inlined_call_operand.hbm [shape: f32[24,32], index: 0, kind: input, shape index: {}]   ;;  %s512_s1 = inlined_call_operand.vmem [shape: f32[1,32], index: 1, kind: input, shape index: {}]   ;;  %s513_s2 = inlined_call_operand.<no memory space> [shape: f32[1], index: 2, kind: input, shape index: {}]   ;;  %s514_s3 = inlined_call_operand.vmem [shape: f32[24,1], index: 3, kind: output, shape index: {}]  }
   0x1   :  { %8 = sst [smem:[#allocation2]] %s513_s2 }
   0x2   :  { %9 = vsyncpa [#allocation4], 0 }
   0x3   :  { %11 = vsyncpa [#allocation4 + $0x1], 0  ;;  %s408_s14 = smov 0   ;;  %s410_s15 = smov 0  }
   0x4   :  { %s412_s16 = smov 0   ;;  %s414_s17 = smov 0  }
   0x5 LB: > { %s427_s2 = sadd.s32 4294967295, %s382_s17   ;;  %s430_s18 = sadd.s32 1, %s382_s17   ;;  %s382_s17 = sphi %s414_s17, %s524_s17   ;;  %s378_s16 = sphi %s412_s16, %s523_s16   ;;  %s374_s15 = sphi %s410_s15, %s522_s15   ;;  %s370_s14 = sphi %s408_s14, %s521_s14  }
   0x6   : > { %s21_s19 = ssub.s32 %s382_s17, %s430_s18  ;;  %s24_s20 = sadd.s32 1, %s378_s16 }
   0x7   : > { %p22_p0 = scmp.eq.s32.totalorder %s21_s19, 0  ;;  %p31_p1 = scmp.ne.s32.totalorder %s378_s16, %s374_s15 }
   0x8   : > { %p32_p2 = scmp.eq.s32.totalorder %s382_s17, 0  ;;  %p37_p3 = scmp.ne.s32.totalorder %s374_s15, %s370_s14 }
   0x9   : > { %s440_s21 = scalar_select %p22_p0, %s378_s16, %s24_s20  }
   0xa   : > { %p33_p4 = por %p32_p2, %p31_p1  ;;  %p38_p5 = scmp.eq.s32.totalorder %s427_s2, 0 }
   0xb   : > { %p287_p6 = scmp.lt.s32.totalorder %s382_s17, 3  ;;  %s135_s23 = sand.u32 1, %s378_s16  }
   0xc   : > { %p444_p7 = por %p38_p5, %p37_p3  ;;  %s273_s24 = sshll.u32 %s135_s23, 3 }
   0xd   : > { %s274_s25 = sshll.u32 %s382_s17, 7  ;;  %s139_s29 = scalar_lea.vmem [#allocation3], %s273_s24 }
   0xe   : > { %s516_s22 = scalar_select %p444_p7, 1, 0 }
   0xf   : > { %s453_s28 = scalar_lea.hbm %s511_s0, %s274_s25  ;;  %s146_s30 = sshll.u32 %s139_s29, 4  ;;  %s455_s30 = int_to_ptr.vmem [resolvable:$true] %s146_s30 }
  0x10   : > { %p457_p8 = pnand %p287_p6, %p33_p4  ;;  %s136_s5 = scalar_lea.sflag [#allocation4], %s135_s23 }
  0x11   : > { %s320_s6 = scalar_lea.hbm %s453_s28, 128  ;;  %s325_s9 = scalar_lea.hbm %s511_s0, 384 }
  0x12   : > { %p321_p11 = scmp.ne.s32.totalorder %s453_s28, %s320_s6  ;;  %p322_p12 = pneg %p457_p8 }
  0x13   : > { %p326_p1 = scmp.lt.s32.totalorder %s453_s28, %s511_s0  ;;  %p327_p2 = scmp.lt.s32.totalorder %s325_s9, %s320_s6 }
  0x14   : > { %p323_p13 = pnand %p322_p12, %p321_p11 }
  0x15   : > { %p328_p3 = por %p327_p2, %p326_p1 }
  0x16   : > { %p324_p0 = pneg %p323_p13 }
  0x18   : > { %p329_p4 = pnand %p328_p3, %p324_p0 }
  0x1a   : > { %332 = shalt.err (!%p329_p4)
}
  0x1b   : > { %s333_s12 = scalar_lea.vmem %s455_s30, 128  ;;  %s384_s13 = smov [#allocation3]  }
  0x1c   : > { %p334_p5 = scmp.ne.s32.totalorder %s455_s30, %s333_s12  ;;  %s338_s14 = sshll.u32 %s384_s13, 4  ;;  %s339_s14 = int_to_ptr.vmem [resolvable:$false] %s338_s14 }
  0x1d   : > { %s340_s19 = scalar_lea.vmem %s339_s14, 256  ;;  %p341_p13 = scmp.lt.s32.totalorder %s455_s30, %s339_s14 }
  0x1e   : > { %p336_p6 = pnand %p334_p5, %p322_p12  ;;  %p342_p9 = scmp.lt.s32.totalorder %s340_s19, %s333_s12 }
  0x20   : > { %p337_p11 = pneg %p336_p6  ;;  %p343_p10 = por %p342_p9, %p341_p13 }
  0x22   : > { %p344_p7 = pnand %p343_p10, %p337_p11 }
  0x24   : > { %347 = shalt.err (!%p344_p7)
}
  0x25   : > { %286 = dma.hbm_to_vmem [thread:$0]  (!%p457_p8), %s453_s28, 128, %s455_s30, %s136_s5  }
  0x26   : > { %p518_p0 = scmp.lt.s32.totalorder %s382_s17, 4  ;;  %p519_p1 = scmp.ge.s32.totalorder %s382_s17, 1 }
  0x28   : > { %p152_p12 = pnand %p519_p1, %p518_p0 }
  0x29   : > { %s157_s20 = sand.u32 (!%p152_p12), 1, %s374_s15   ;;  %p520_p9 = scmp.ne.s32.totalorder (!%p152_p12), %s516_s22, 0 }
  0x2a   : > { %155 = sbr.rel (%p152_p12) target bundleno = 194 (0xc2), region = 32  ;;  %s276_s23 = sshll.u32 (!%p152_p12), %s157_s20, 3 }
  0x2b   : > { %s158_s24 = scalar_lea.sflag (!%p152_p12), [#allocation4], %s157_s20  ;;  %s161_s25 = scalar_lea.vmem (!%p152_p12), [#allocation3], %s276_s23 }
  0x2f   : > { %365 = dma.done.wait (%p520_p9), %s158_s24, 128  }
  0x30   : > { %367 = vsyncadd (%p520_p9), %s158_s24, 4294967168  ;;  %v187_v0 = vld [vmem:[%s161_s25] sm:$0xff]  ;;  %vm196_vm0 = vcmask 261120   ;;  %p183_p7 = scmp.lt.s32.totalorder %s427_s2, 2  ;;  %s200_s17 = sld [smem:[#allocation2]]  ;;  %vm203_vm1 = vcmask 7168  }
  0x31   : > { %v278_v1 = vld [vmem:[%s512_s1] ss:$0 sm:$0xff] }
  0x32   : > { %v195_v2 = vmul.f32 %v278_v1, %v187_v0  ;;  %s526_s2 = smov (!%p183_p7, %s427_s2), 2 }
  0x33   : > { %s277_s28 = sshll.u32 %s526_s2, 3 }
  0x34   : > { %v197_v3 = vsel %vm196_vm0, %v195_v2, 0.0  ;;  %s186_s22 = scalar_lea.vmem %s514_s3, %s277_s28 }
  0x35   : > { %198 = vadd.xlane.f32.xlu0 %v197_v3 }
  0x36   : > { %v201_v4 = vstv %s200_s17 }
  0xbe   : > { %v199_v5 = vpop.xlane.xlu0 %198 }
  0xbf   : > { %v202_v6 = vadd.f32 %v201_v4, %v199_v5 }
  0xc1   : > { %204 = vst.msk [vmem:[%s186_s22] sm:$0xff] %vm203_vm1, %v202_v6 }
  0xc2 PF: > { %p14_p8 = scmp.ge.s32.totalorder %s430_s18, 5   ;;  %s521_s14 = smov %s374_s15 }
  0xc3   : > { %s522_s15 = smov %s378_s16  ;;  %s523_s16 = smov %s440_s21 }
  0xc4   : > { %s524_s17 = smov %s430_s18  ;;  %16 = sbr.rel (!%p14_p8) target bundleno = 5 (0x5), region = 72 }
  0xc9   :  { %224 = vsyncpa [#allocation4], 1 }
  0xca   :  { %226 = vsyncpa [#allocation4 + $0x1], 1 }

</bundles_post_ra>
